<compile_context>
chip_gen: v5e
topology: v5e:2x2
jax: 0.10.0
libtpu: 0.0.40
codegen_flags: <defaults>
</compile_context>

<pallas_src>
import math

import jax
import jax.numpy as jnp
from jax.experimental import pallas as pl
from jax.experimental.pallas import tpu as pltpu


# --------------------------------------------------------------------------- #
# Small helpers
# --------------------------------------------------------------------------- #
def _round_up(x, m):
    return (x + m - 1) // m * m


def _pad_to(a, shape):
    pads = tuple((0, t - s) for s, t in zip(a.shape, shape))
    if any(p[1] for p in pads):
        a = jnp.pad(a, pads)
    return a


def _vmem_limit_bytes():
    """Per-generation VMEM budget: ~3/4 of physical (96 MiB on v5e/v6e,
    48 MiB on v7x); conservative 48 MiB fallback if the query fails."""
    try:
        info = pltpu.get_tpu_info()
        cap = getattr(info, "vmem_capacity_bytes", None)
        if cap:
            return int(min(cap * 3 // 4, 110 * 1024 * 1024))
    except Exception:
        pass
    return 48 * 1024 * 1024


def _choose_row_tile(M, max_tm, align):
    """Largest aligned row tile <= max_tm, preferring >= 2 tiles (v7x megacore)
    and multiples of 256 (MXU height) when M allows."""
    cap = min(max_tm, _round_up(M, align))
    if M >= 2 * align:
        cap = min(cap, _round_up((M + 1) // 2, align))
    if cap >= 256:
        cap = cap // 256 * 256
    else:
        cap = max(align, cap // align * align)
    return cap


def _tm_candidates(tm0, align, floor):
    floor = min(floor, tm0)
    cands, t = [], tm0
    while t >= floor:
        cands.append(t)
        nxt = max(align, (t // 2) // align * align)
        if nxt >= t:
            break
        t = nxt
    return cands


def _plan(M, d_model_p, d_ff_p, itm, out_itm, vmem_limit):
    """Pick (resident, tm, tk_ff) from static shapes and the VMEM budget."""
    budget = int(vmem_limit * 0.85)
    align = 16 if itm < 4 else 8                 # bf16 packs 2 rows / sublane
    tm_pref = _choose_row_tile(M, 1024, align)   # roofline: big tm -> compute-bound

    def resident_bytes(tm):
        return (4 * d_model_p * d_ff_p * itm             # W1+W2 (double-buffered)
                + 2 * tm * d_model_p * (itm + out_itm)   # x / out tiles (DB)
                + 4 * tm * d_ff_p                        # f32 hidden intermediate
                + 8 * (d_ff_p + d_model_p))               # biases

    def streamed_bytes(tm, tk):
        return (4 * d_model_p * tk * itm                  # W1/W2 chunks (DB)
                + 2 * tm * d_model_p * (itm + out_itm)    # x / out tiles (DB)
                + 4 * tm * d_model_p                      # f32 accumulator scratch
                + 4 * tm * tk                             # f32 hidden chunk
                + 8 * (tk + d_model_p))

    # 1) weight-resident plan (weights DMA'd once per call) -- best HBM traffic.
    for tm in _tm_candidates(tm_pref, align, 128):
        if resident_bytes(tm) <= budget:
            return True, tm, d_ff_p

    # 2) streamed plan: largest row tile first (weight traffic ~ M_p/tm), then
    #    the largest d_ff chunk that divides d_ff_p and fits VMEM.
    q = d_ff_p // 128
    for tm in _tm_candidates(tm_pref, align, 128):
        for n in range(1, q + 1):
            if q % n:
                continue
            tk = d_ff_p // n
            if streamed_bytes(tm, tk) <= budget:
                return False, tm, tk

    # Last resort (pathological shapes): smallest tiles.
    return False, min(tm_pref, 128), 128


# --------------------------------------------------------------------------- #
# Kernels
# --------------------------------------------------------------------------- #
def _ffn_resident_kernel(x_ref, w1_ref, b1_ref, w2_ref, b2_ref, o_ref):
    # Full weights resident in VMEM; 1-D grid over row tiles.
    h = jnp.dot(x_ref[...], w1_ref[...], preferred_element_type=jnp.float32)
    h = jnp.maximum(h + b1_ref[...], 0.0)
    # Dropout: identity in eval mode.
    y = jnp.dot(h.astype(w2_ref.dtype), w2_ref[...],
                preferred_element_type=jnp.float32)
    o_ref[...] = (y + b2_ref[...]).astype(o_ref.dtype)


def _ffn_streamed_kernel(x_ref, w1_ref, b1_ref, w2_ref, b2_ref, o_ref, acc_ref):
    # d_ff streamed as the trailing reduction axis; f32 accumulator in VMEM.
    k = pl.program_id(1)

    @pl.when(k == 0)
    def _init():
        acc_ref[...] = jnp.zeros_like(acc_ref)

    h = jnp.dot(x_ref[...], w1_ref[...], preferred_element_type=jnp.float32)
    h = jnp.maximum(h + b1_ref[...], 0.0)
    acc_ref[...] += jnp.dot(h.astype(w2_ref.dtype), w2_ref[...],
                            preferred_element_type=jnp.float32)

    @pl.when(k == pl.num_programs(1) - 1)
    def _finalize():
        o_ref[...] = (acc_ref[...] + b2_ref[...]).astype(o_ref.dtype)


# --------------------------------------------------------------------------- #
# Wrappers
# --------------------------------------------------------------------------- #
def prepare_ffn_params(w1, b1, w2, b2, compute_dtype=jnp.bfloat16):
    """Cast + lane-dense zero-pad the FFN parameters ONCE (hoisted out of the
    per-call path).  w1: [d_model, d_ff], w2: [d_ff, d_model]."""
    d_model, d_ff = w1.shape
    d_model_p = _round_up(d_model, 128)
    d_ff_p = _round_up(d_ff, 128)
    w1p = _pad_to(jnp.asarray(w1, compute_dtype), (d_model_p, d_ff_p))
    b1p = _pad_to(jnp.asarray(b1, jnp.float32).reshape(1, d_ff), (1, d_ff_p))
    w2p = _pad_to(jnp.asarray(w2, compute_dtype), (d_ff_p, d_model_p))
    b2p = _pad_to(jnp.asarray(b2, jnp.float32).reshape(1, d_model), (1, d_model_p))
    return w1p, b1p, w2p, b2p


@jax.jit
def ffn_apply(x, w1p, b1p, w2p, b2p):
    """Apply the FFN to x [..., d_model] using pre-padded parameters."""
    *lead, d_model = x.shape
    M = math.prod(lead)
    d_model_p, d_ff_p = w1p.shape
    cdt = w1p.dtype
    out_dtype = x.dtype
    itm = jnp.dtype(cdt).itemsize
    out_itm = jnp.dtype(out_dtype).itemsize

    vmem_limit = _vmem_limit_bytes()
    resident, tm, tk = _plan(M, d_model_p, d_ff_p, itm, out_itm, vmem_limit)
    M_p = _round_up(M, tm)
    n_row = M_p // tm

    x2 = _pad_to(x.reshape(M, d_model).astype(cdt), (M_p, d_model_p))

    # Cost estimate with the true weight-read multiplicity.
    w_reads = 1 if resident else n_row
    cost = pl.CostEstimate(
        flops=4 * M_p * d_model_p * d_ff_p,
        transcendentals=0,
        bytes_accessed=(M_p * d_model_p * (itm + out_itm)
                        + w_reads * 2 * d_model_p * d_ff_p * itm
                        + 4 * (d_ff_p + d_model_p)),
    )

    if resident:
        # Weights fit VMEM: constant index_maps -> DMA'd exactly once per call.
        grid_spec = pltpu.PrefetchScalarGridSpec(
            num_scalar_prefetch=0,
            grid=(n_row,),
            in_specs=[
                pl.BlockSpec((tm, d_model_p), lambda i: (i, 0)),        # x tile
                pl.BlockSpec((d_model_p, d_ff_p), lambda i: (0, 0)),    # W1 (resident)
                pl.BlockSpec((1, d_ff_p), lambda i: (0, 0)),            # b1
                pl.BlockSpec((d_ff_p, d_model_p), lambda i: (0, 0)),    # W2 (resident)
                pl.BlockSpec((1, d_model_p), lambda i: (0, 0)),         # b2
            ],
            out_specs=pl.BlockSpec((tm, d_model_p), lambda i: (i, 0)),
            scratch_shapes=[],
        )
        kernel = _ffn_resident_kernel
        dims = ("parallel",)
    else:
        # Large FFN: stream W1/W2 chunks along a trailing reduction axis.
        # (If weight DMA were still exposed on v5e, pipeline_mode=pl.Buffered(3)
        #  on the W1/W2 specs would be the next knob.)
        grid_spec = pltpu.PrefetchScalarGridSpec(
            num_scalar_prefetch=0,
            grid=(n_row, d_ff_p // tk),
            in_specs=[
                pl.BlockSpec((tm, d_model_p), lambda i, k: (i, 0)),     # x tile
                pl.BlockSpec((d_model_p, tk), lambda i, k: (0, k)),     # W1 chunk
                pl.BlockSpec((1, tk), lambda i, k: (0, k)),             # b1 chunk
                pl.BlockSpec((tk, d_model_p), lambda i, k: (k, 0)),     # W2 chunk
                pl.BlockSpec((1, d_model_p), lambda i, k: (0, 0)),      # b2
            ],
            out_specs=pl.BlockSpec((tm, d_model_p), lambda i, k: (i, 0)),
            scratch_shapes=[pltpu.VMEM((tm, d_model_p), jnp.float32)],
        )
        kernel = _ffn_streamed_kernel
        dims = ("parallel", "arbitrary")

    out2 = pl.pallas_call(
        kernel,
        out_shape=jax.ShapeDtypeStruct((M_p, d_model_p), out_dtype),
        grid_spec=grid_spec,
        compiler_params=pltpu.CompilerParams(
            dimension_semantics=dims,
            vmem_limit_bytes=int(vmem_limit),
        ),
        cost_estimate=cost,
    )(x2, w1p, b1p, w2p, b2p)

    return out2[:M, :d_model].reshape(*lead, d_model)


def position_wise_feed_forward(x, w1, b1, w2, b2, *, compute_dtype=jnp.bfloat16):
    """Convenience wrapper matching the PyTorch module in eval mode.

    bf16 matmul inputs (f32 accumulation) by default; pass
    compute_dtype=jnp.float32 for exact f32 numerics.  For production, call
    prepare_ffn_params once and ffn_apply directly so the weight cast/pad is
    not paid per call.
    """
    params = prepare_ffn_params(w1, b1, w2, b2, compute_dtype)
    return ffn_apply(x, *params)


def _reference(x, w1, b1, w2, b2):
    h = jnp.maximum(jnp.einsum("bctl,lf->bctf", x, w1) + b1, 0.0)
    return jnp.einsum("bctf,fl->bctl", h, w2) + b2


if __name__ == "__main__":
    key = jax.random.PRNGKey(0)
    B, C, T = 2, 4, 8          # batch, channel, token
    d_model, d_ff = 32, 64     # latent / hidden

    k_x, k_w1, k_b1, k_w2, k_b2 = jax.random.split(key, 5)
    x = jax.random.normal(k_x, (B, C, T, d_model), dtype=jnp.float32)

    # Deterministic parameter init (kaiming-uniform-ish like torch Linear),
    # stored as (in, out) so the kernel multiplies without a transpose.
    lim1 = 1.0 / (d_model ** 0.5)
    lim2 = 1.0 / (d_ff ** 0.5)
    w1 = jax.random.uniform(k_w1, (d_model, d_ff), jnp.float32, -lim1, lim1)
    b1 = jax.random.uniform(k_b1, (d_ff,), jnp.float32, -lim1, lim1)
    w2 = jax.random.uniform(k_w2, (d_ff, d_model), jnp.float32, -lim2, lim2)
    b2 = jax.random.uniform(k_b2, (d_model,), jnp.float32, -lim2, lim2)

    ref = _reference(x, w1, b1, w2, b2)

    # f32 matmul inputs (hoisted prep + direct apply): matches torch numerics.
    params_f32 = prepare_ffn_params(w1, b1, w2, b2, compute_dtype=jnp.float32)
    out_f32 = jax.block_until_ready(ffn_apply(x, *params_f32))
    assert out_f32.shape == (B, C, T, d_model)
    assert jnp.allclose(out_f32, ref, atol=1e-4, rtol=1e-4), "f32 mismatch vs reference"

    # Default production path: bf16 matmul inputs with f32 accumulation.
    out_bf16 = jax.block_until_ready(position_wise_feed_forward(x, w1, b1, w2, b2))
    assert out_bf16.shape == (B, C, T, d_model)
    assert jnp.allclose(out_bf16, ref, atol=1e-1, rtol=1e-1), "bf16 mismatch vs reference"

    print("KERNEL_OK")
</pallas_src>

<mosaic_0001>
module attributes {stable_mosaic.version = 11 : i64} {
  func.func @_ffn_resident_kernel(%arg0: i32, %arg1: memref<32x128xf32, #tpu.memory_space<vmem>>, %arg2: memref<128x128xf32, #tpu.memory_space<vmem>>, %arg3: memref<1x128xf32, #tpu.memory_space<vmem>>, %arg4: memref<128x128xf32, #tpu.memory_space<vmem>>, %arg5: memref<1x128xf32, #tpu.memory_space<vmem>>, %arg6: memref<32x128xf32, #tpu.memory_space<vmem>>) attributes {dimension_semantics = [#tpu.dimension_semantics<parallel>], iteration_bounds = array<i64: 2>, scalar_prefetch = 0 : i64, scratch_operands = 0 : i64, tpu.core_type = #tpu.core_type<tc>, window_params = [{transform_indices = @transform_0, window_bounds = array<i64: 32, 128>}, {pipeline_mode = #tpu.pipeline_mode<synchronous>, transform_indices = @transform_1, window_bounds = array<i64: 128, 128>}, {pipeline_mode = #tpu.pipeline_mode<synchronous>, transform_indices = @transform_2, window_bounds = array<i64: 1, 128>}, {pipeline_mode = #tpu.pipeline_mode<synchronous>, transform_indices = @transform_3, window_bounds = array<i64: 128, 128>}, {pipeline_mode = #tpu.pipeline_mode<synchronous>, transform_indices = @transform_4, window_bounds = array<i64: 1, 128>}, {transform_indices = @transform_5, window_bounds = array<i64: 32, 128>}]} {
    %c0 = arith.constant 0 : index
    %c0_0 = arith.constant 0 : index
    %0 = vector.load %arg1[%c0, %c0_0] : memref<32x128xf32, #tpu.memory_space<vmem>>, vector<32x128xf32>
    %c0_1 = arith.constant 0 : index
    %c0_2 = arith.constant 0 : index
    %1 = vector.load %arg2[%c0_1, %c0_2] : memref<128x128xf32, #tpu.memory_space<vmem>>, vector<128x128xf32>
    %cst = arith.constant dense<0.000000e+00> : vector<32x128xf32>
    %2 = tpu.matmul %0, %1, %cst {dimension_numbers = #tpu.dot_dimension_numbers<[1], [0], [0], [1], [0, 0, 1, 1], [], []>} : vector<32x128xf32>, vector<128x128xf32>, vector<32x128xf32> -> vector<32x128xf32>
    %c0_3 = arith.constant 0 : index
    %c0_4 = arith.constant 0 : index
    %3 = vector.load %arg3[%c0_3, %c0_4] : memref<1x128xf32, #tpu.memory_space<vmem>>, vector<1x128xf32>
    %4 = vector.broadcast %3 : vector<1x128xf32> to vector<32x128xf32>
    %5 = arith.addf %2, %4 : vector<32x128xf32>
    %cst_5 = arith.constant 0.000000e+00 : f32
    %6 = vector.broadcast %cst_5 : f32 to vector<32x128xf32>
    %7 = arith.maximumf %5, %6 : vector<32x128xf32>
    %c0_6 = arith.constant 0 : index
    %c0_7 = arith.constant 0 : index
    %8 = vector.load %arg4[%c0_6, %c0_7] : memref<128x128xf32, #tpu.memory_space<vmem>>, vector<128x128xf32>
    %cst_8 = arith.constant dense<0.000000e+00> : vector<32x128xf32>
    %9 = tpu.matmul %7, %8, %cst_8 {dimension_numbers = #tpu.dot_dimension_numbers<[1], [0], [0], [1], [0, 0, 1, 1], [], []>} : vector<32x128xf32>, vector<128x128xf32>, vector<32x128xf32> -> vector<32x128xf32>
    %c0_9 = arith.constant 0 : index
    %c0_10 = arith.constant 0 : index
    %10 = vector.load %arg5[%c0_9, %c0_10] : memref<1x128xf32, #tpu.memory_space<vmem>>, vector<1x128xf32>
    %11 = vector.broadcast %10 : vector<1x128xf32> to vector<32x128xf32>
    %12 = arith.addf %9, %11 : vector<32x128xf32>
    %c0_11 = arith.constant 0 : index
    %c0_12 = arith.constant 0 : index
    %13 = vector.load %arg6[%c0_11, %c0_12] : memref<32x128xf32, #tpu.memory_space<vmem>>, vector<32x128xf32>
    tpu.vector_store %arg6[%c0_11, %c0_12], %12 {strides = array<i32>} : memref<32x128xf32, #tpu.memory_space<vmem>>, vector<32x128xf32>,
    return
  }
  func.func @transform_0(%arg0: i32) -> (i32, i32) {
    %c0_i32 = arith.constant 0 : i32
    %c0_i32_0 = arith.constant 0 : i32
    return %arg0, %c0_i32 : i32, i32
  }
  func.func @transform_1(%arg0: i32) -> (i32, i32) {
    %c0_i32 = arith.constant 0 : i32
    %c0_i32_0 = arith.constant 0 : i32
    %c0_i32_1 = arith.constant 0 : i32
    return %c0_i32, %c0_i32_0 : i32, i32
  }
  func.func @transform_2(%arg0: i32) -> (i32, i32) {
    %c0_i32 = arith.constant 0 : i32
    %c0_i32_0 = arith.constant 0 : i32
    %c0_i32_1 = arith.constant 0 : i32
    return %c0_i32, %c0_i32_0 : i32, i32
  }
  func.func @transform_3(%arg0: i32) -> (i32, i32) {
    %c0_i32 = arith.constant 0 : i32
    %c0_i32_0 = arith.constant 0 : i32
    %c0_i32_1 = arith.constant 0 : i32
    return %c0_i32, %c0_i32_0 : i32, i32
  }
  func.func @transform_4(%arg0: i32) -> (i32, i32) {
    %c0_i32 = arith.constant 0 : i32
    %c0_i32_0 = arith.constant 0 : i32
    %c0_i32_1 = arith.constant 0 : i32
    return %c0_i32, %c0_i32_0 : i32, i32
  }
  func.func @transform_5(%arg0: i32) -> (i32, i32) {
    %c0_i32 = arith.constant 0 : i32
    %c0_i32_0 = arith.constant 0 : i32
    return %arg0, %c0_i32 : i32, i32
  }
}

</mosaic_0001>

<bundles_post_ra>
// kernel: ffn_apply.1
= control target key start
LH: loop header
LB: loop body
LE: loop exit
PB: predicated region body
PF: predicated region fallthrough
CT: control target
= control target key end

     0   :  { %10 = vsyncpa [#allocation3], 0  ;;  %s827_s0 = inlined_call_operand.vmem [shape: f32[64,128], index: 0, kind: input, shape index: {}]   ;;  %s828_s1 = inlined_call_operand.vmem [shape: f32[128,128], index: 1, kind: input, shape index: {}]   ;;  %s829_s2 = inlined_call_operand.vmem [shape: f32[1,128], index: 2, kind: input, shape index: {}]   ;;  %s830_s3 = inlined_call_operand.hbm [shape: f32[128,128], index: 3, kind: input, shape index: {}]   ;;  %s831_s4 = inlined_call_operand.vmem [shape: f32[1,128], index: 4, kind: input, shape index: {}]   ;;  %s832_s5 = inlined_call_operand.hbm [shape: f32[64,128], index: 5, kind: output, shape index: {}]  }
   0x1   :  { %11 = vsyncpa [#allocation4], 0 }
   0x2   :  { %13 = vsyncpa [#allocation4 + $0x1], 0  ;;  %s679_s18 = smov 0   ;;  %s681_s19 = smov 0  }
   0x3   :  { %s683_s20 = smov 0   ;;  %s685_s21 = smov 0  }
   0x4 LB: > { %s700_s22 = sadd.s32 4294967295, %s642_s21   ;;  %s443_s23 = sadd.s32 4294967294, %s642_s21   ;;  %s642_s21 = sphi %s685_s21, %s838_s21   ;;  %s638_s20 = sphi %s683_s20, %s837_s20   ;;  %s634_s19 = sphi %s681_s19, %s836_s19   ;;  %s630_s18 = sphi %s679_s18, %s835_s18  }
   0x5   : > { %s704_s24 = sadd.s32 1, %s642_s21   ;;  %s136_s25 = sadd.s32 1, %s638_s20 }
   0x6   : > { %s133_s26 = ssub.s32 %s642_s21, %s704_s24  ;;  %p146_p0 = scmp.ne.s32.totalorder %s638_s20, %s634_s19 }
   0x7   : > { %p134_p1 = scmp.eq.s32.totalorder %s133_s26, 0  ;;  %p147_p2 = scmp.eq.s32.totalorder %s700_s22, 1 }
   0x8   : > { %p152_p3 = scmp.ne.s32.totalorder %s634_s19, %s630_s18  ;;  %p153_p4 = scmp.eq.s32.totalorder %s443_s23, 1 }
   0x9   : > { %s715_s27 = scalar_select %p134_p1, %s638_s20, %s136_s25  }
   0xa   : > { %p717_p5 = por %p147_p2, %p146_p0  ;;  %p721_p6 = por %p153_p4, %p152_p3 }
   0xb   : > { %p444_p7 = scmp.ge.s32.totalorder %s642_s21, 1  ;;  %p160_p8 = scmp.lt.s32.totalorder %s642_s21, 3 }
   0xc   : > { %p504_p9 = scmp.eq.s32.totalorder %s700_s22, 0  ;;  %s177_s7 = sshll.u32 %s830_s3, 4  ;;  %s178_s7 = int_to_ptr.hbm [resolvable:$true] %s177_s7 }
   0xd   : > { %p161_p10 = pnand %p444_p7, %p160_p8  ;;  %s644_s8 = smov [#allocation2]  }
   0xe   : > { %s179_s9 = sshll.u32 %s644_s8, 4  ;;  %s645_s10 = smov 128   ;;  %s180_s9 = int_to_ptr.vmem [resolvable:$true] %s179_s9 }
   0xf   : > { %p496_p11 = pneg %p161_p10  ;;  %s646_s11 = smov 8  }
  0x10   : > { %207 = sbr.rel (%p161_p10) target bundleno = 336 (0x150), region = 40 }
  0x11   : > { %p497_p12 = pnand %p504_p9, %p496_p11 }
  0x13   : > { %499 = dma.hbm_to_vmem [thread:$0]  (!%p497_p12), %s178_s7, 2048, %s180_s9, [#allocation3], %s645_s10, %s645_s10, %s646_s11  }
  0x15   : > { %621 = dma.done.wait (%p504_p9), [#allocation3], 2048  }
  0x16   : > { %623 = vsyncadd (%p504_p9), [#allocation3], 4294965248  ;;  %v262_v0 = vld [vmem:[%s828_s1 + $0x78] sm:$0xff]  ;;  %v261_v1 = vld [vmem:[%s828_s1 + $0x70] sm:$0xff]  ;;  %s450_s12 = sshll.u32 %s700_s22, 2  ;;  %s233_s25 = sand.u32 1, %s634_s19  }
  0x17   : > { %458 = vmatpush.msra.mxu2 %v262_v0  ;;  %267 = vmatpush.msra.mxu0 %v262_v0  ;;  %v260_v2 = vld [vmem:[%s828_s1 + $0x68] sm:$0xff]  ;;  %v259_v3 = vld [vmem:[%s828_s1 + $0x60] sm:$0xff]  ;;  %v258_v4 = vld [vmem:[%s828_s1 + $0x58] sm:$0xff]  ;;  %p237_p13 = scmp.lt.s32.totalorder %s450_s12, 7  ;;  %s449_s26 = sshll.u32 %s233_s25, 5 }
  0x18   : > { %v257_v5 = vld [vmem:[%s828_s1 + $0x50] sm:$0xff]  ;;  %v315_v6 = vld [vmem:[#allocation2 + $0x78] sm:$0xff]  ;;  %v256_v8 = vld [vmem:[%s828_s1 + $0x48] sm:$0xff]  ;;  %s457_s8 = sshll.u32 %s700_s22, 5  ;;  %s596_s23 = scalar_lea.hbm %s832_s5, 64 }
  0x19   : > { %459 = vmatpush.msra.mxu2 %v261_v1  ;;  %268 = vmatpush.msra.mxu0 %v261_v1  ;;  %v314_v7 = vld [vmem:[#allocation2 + $0x70] sm:$0xff]  ;;  %v313_v9 = vld [vmem:[#allocation2 + $0x68] sm:$0xff]  ;;  %v255_v10 = vld [vmem:[%s828_s1 + $0x40] sm:$0xff]  ;;  %s840_s12 = smov (!%p237_p13, %s450_s12), 7  ;;  %s365_s11 = scalar_lea.hbm %s832_s5, %s457_s8 }
  0x1a   : > { %474 = vmatpush.msra.mxu3 %v315_v6  ;;  %320 = vmatpush.msra.mxu1 %v315_v6  ;;  %v312_v11 = vld [vmem:[#allocation2 + $0x60] sm:$0xff]  ;;  %v254_v12 = vld [vmem:[%s828_s1 + $0x38] sm:$0xff]  ;;  %v253_v14 = vld [vmem:[%s828_s1 + $0x30] sm:$0xff]  ;;  %s451_s7 = sshll.u32 %s840_s12, 3  ;;  %s368_s14 = sshll.u32 %s365_s11, 4  ;;  %s369_s14 = int_to_ptr.hbm [resolvable:$true] %s368_s14 }
  0x1b   : > { %460 = vmatpush.msra.mxu2 %v260_v2  ;;  %269 = vmatpush.msra.mxu0 %v260_v2  ;;  %v311_v13 = vld [vmem:[#allocation2 + $0x58] sm:$0xff]  ;;  %v310_v15 = vld [vmem:[#allocation2 + $0x50] sm:$0xff]  ;;  %v252_v16 = vld [vmem:[%s828_s1 + $0x28] sm:$0xff]  ;;  %s240_s15 = scalar_lea.vmem %s827_s0, %s451_s7  ;;  %s235_s7 = scalar_lea.vmem [#allocation5], %s449_s26 }
  0x1c   : > { %475 = vmatpush.msra.mxu3 %v314_v7  ;;  %321 = vmatpush.msra.mxu1 %v314_v7  ;;  %v309_v17 = vld [vmem:[#allocation2 + $0x48] sm:$0xff]  ;;  %v251_v18 = vld [vmem:[%s828_s1 + $0x20] sm:$0xff]  ;;  %v250_v20 = vld [vmem:[%s828_s1 + $0x18] sm:$0xff]  ;;  %s366_s13 = sshll.u32 %s235_s7, 4  ;;  %s590_s12 = sshra.s32 %s369_s14, 4  ;;  %s367_s13 = int_to_ptr.vmem [resolvable:$true] %s366_s13  ;;  %s591_s12 = int_to_ptr.hbm [resolvable:$true] %s590_s12 }
  0x1d   : > { %461 = vmatpush.msra.mxu2 %v259_v3  ;;  %270 = vmatpush.msra.mxu0 %v259_v3  ;;  %v308_v19 = vld [vmem:[#allocation2 + $0x40] sm:$0xff]  ;;  %v307_v21 = vld [vmem:[#allocation2 + $0x38] sm:$0xff]  ;;  %v249_v22 = vld [vmem:[%s828_s1 + $0x10] sm:$0xff]  ;;  %s592_s16 = scalar_lea.hbm %s591_s12, 32  ;;  %p597_p3 = scmp.lt.s32.totalorder %s591_s12, %s832_s5 }
  0x1e   : > { %476 = vmatpush.msra.mxu3 %v313_v9  ;;  %322 = vmatpush.msra.mxu1 %v313_v9  ;;  %v306_v23 = vld [vmem:[#allocation2 + $0x30] sm:$0xff]  ;;  %v248_v24 = vld [vmem:[%s828_s1 + $0x8] sm:$0xff]  ;;  %v247_v26 = vld [vmem:[%s828_s1] sm:$0xff]  ;;  %p593_p0 = scmp.ne.s32.totalorder %s591_s12, %s592_s16  ;;  %p598_p4 = scmp.lt.s32.totalorder %s596_s23, %s592_s16 }
  0x1f   : > { %462 = vmatpush.msra.mxu2 %v258_v4  ;;  %271 = vmatpush.msra.mxu0 %v258_v4  ;;  %v305_v25 = vld [vmem:[#allocation2 + $0x28] sm:$0xff]  ;;  %v245_v27 = vld [vmem:[%s240_s15 + $0x10] sm:$0xff]  ;;  %v243_v28 = vld [vmem:[%s240_s15] sm:$0xff] }
  0x20   : > { %477 = vmatpush.msra.mxu3 %v312_v11  ;;  %323 = vmatpush.msra.mxu1 %v312_v11  ;;  %v304_v29 = vld [vmem:[#allocation2 + $0x20] sm:$0xff]  ;;  %v303_v30 = vld [vmem:[#allocation2 + $0x18] sm:$0xff]  ;;  %v244_v32 = vld [vmem:[%s240_s15 + $0x8] sm:$0xff]  ;;  %p594_p1 = pnand %p593_p0, %p717_p5  ;;  %p599_p7 = por %p598_p4, %p597_p3 }
  0x21   : > { %463 = vmatpush.msra.mxu2 %v257_v5  ;;  %272 = vmatpush.msra.mxu0 %v257_v5  ;;  %v246_v31 = vld [vmem:[%s240_s15 + $0x18] sm:$0xff]  ;;  %v302_v33 = vld [vmem:[#allocation2 + $0x10] sm:$0xff]  ;;  %v301_v34 = vld [vmem:[#allocation2 + $0x8] sm:$0xff]  ;;  %s354_s15 = scalar_lea.sflag [#allocation4], %s233_s25 }
  0x22   : > { %478 = vmatpush.msra.mxu3 %v311_v13  ;;  %324 = vmatpush.msra.mxu1 %v311_v13  ;;  %v300_v35 = vld [vmem:[#allocation2] sm:$0xff]  ;;  %p595_p2 = pneg %p594_p1 }
  0x23   : > { %464 = vmatpush.msra.mxu2 %v256_v8  ;;  %273 = vmatpush.msra.mxu0 %v256_v8  ;;  %v544_v36 = vld [vmem:[%s829_s2] ss:$0 sm:$0xff] }
  0x24   : > { %479 = vmatpush.msra.mxu3 %v310_v15  ;;  %325 = vmatpush.msra.mxu1 %v310_v15  ;;  %v545_v49 = vld [vmem:[%s831_s4] ss:$0 sm:$0xff]  ;;  %p600_p8 = pnand %p599_p7, %p595_p2 }
  0x25   : > { %465 = vmatpush.msra.mxu2 %v255_v10  ;;  %274 = vmatpush.msra.mxu0 %v255_v10 }
  0x26   : > { %480 = vmatpush.msra.mxu3 %v309_v17  ;;  %326 = vmatpush.msra.mxu1 %v309_v17 }
  0x27   : > { %466 = vmatpush.msra.mxu2 %v254_v12  ;;  %275 = vmatpush.msra.mxu0 %v254_v12 }
  0x28   : > { %481 = vmatpush.msra.mxu3 %v308_v19  ;;  %327 = vmatpush.msra.mxu1 %v308_v19 }
  0x29   : > { %467 = vmatpush.msra.mxu2 %v253_v14  ;;  %276 = vmatpush.msra.mxu0 %v253_v14 }
  0x2a   : > { %482 = vmatpush.msra.mxu3 %v307_v21  ;;  %328 = vmatpush.msra.mxu1 %v307_v21 }
  0x2b   : > { %468 = vmatpush.msra.mxu2 %v252_v16  ;;  %277 = vmatpush.msra.mxu0 %v252_v16 }
  0x2c   : > { %483 = vmatpush.msra.mxu3 %v306_v23  ;;  %329 = vmatpush.msra.mxu1 %v306_v23 }
  0x2d   : > { %469 = vmatpush.msra.mxu2 %v251_v18  ;;  %278 = vmatpush.msra.mxu0 %v251_v18 }
  0x2e   : > { %484 = vmatpush.msra.mxu3 %v305_v25  ;;  %330 = vmatpush.msra.mxu1 %v305_v25 }
  0x2f   : > { %470 = vmatpush.msra.mxu2 %v250_v20  ;;  %279 = vmatpush.msra.mxu0 %v250_v20 }
  0x30   : > { %485 = vmatpush.msra.mxu3 %v304_v29  ;;  %331 = vmatpush.msra.mxu1 %v304_v29 }
  0x31   : > { %471 = vmatpush.msra.mxu2 %v249_v22  ;;  %280 = vmatpush.msra.mxu0 %v249_v22 }
  0x32   : > { %486 = vmatpush.msra.mxu3 %v303_v30  ;;  %332 = vmatpush.msra.mxu1 %v303_v30 }
  0x33   : > { %472 = vmatpush.msra.mxu2 %v248_v24  ;;  %281 = vmatpush.msra.mxu0 %v248_v24 }
  0x34   : > { %487 = vmatpush.msra.mxu3 %v302_v33  ;;  %333 = vmatpush.msra.mxu1 %v302_v33 }
  0x35   : > { %473 = vmatpush.msra.mxu2 %v247_v26  ;;  %282 = vmatpush.msra.mxu0 %v247_v26 }
  0x36   : > { %289 = vmatmul.f32.vlgmr.msra.gmra.mxu2 %v245_v27  ;;  %283 = vmatmul.f32.vlgmr.msra.gmra.mxu0 %v243_v28 }
  0x37   : > { %488 = vmatpush.msra.mxu3 %v301_v34  ;;  %334 = vmatpush.msra.mxu1 %v301_v34 }
  0x39   : > { %489 = vmatpush.msra.mxu3 %v300_v35  ;;  %335 = vmatpush.msra.mxu1 %v300_v35 }
  0x3e   : > { %292 = vmatmul.f32.gmra.mxu2 %v246_v31  ;;  %286 = vmatmul.f32.gmra.mxu0 %v244_v32 }
  0xb3   : > { %v284_v37 = vpop.f32.mrf.mxu0 }
  0xb4   : > { %v285_v38 = vadd.f32 %v544_v36, %v284_v37 }
  0xb6   : > { %v296_v39 = vmax.f32 %v285_v38, 0.0 }
  0xb8   : > { %336 = vmatmul.f32.vlgmr.msra.gmra.mxu1 %v296_v39 }
  0xb9   : > { %v290_v40 = vpop.f32.mrf.mxu2 }
  0xba   : > { %v291_v41 = vadd.f32 %v544_v36, %v290_v40 }
  0xbb   : > { %v287_v42 = vpop.f32.mrf.mxu0 }
  0xbc   : > { %v298_v43 = vmax.f32 %v291_v41, 0.0  ;;  %v288_v44 = vadd.f32 %v544_v36, %v287_v42 }
  0xbe   : > { %342 = vmatmul.f32.vlgmr.msra.gmra.mxu3 %v298_v43  ;;  %v297_v45 = vmax.f32 %v288_v44, 0.0 }
  0xc0   : > { %339 = vmatmul.f32.gmra.mxu1 %v297_v45 }
  0xc1   : > { %v293_v46 = vpop.f32.mrf.mxu2 }
  0xc2   : > { %v294_v47 = vadd.f32 %v544_v36, %v293_v46 }
  0xc4   : > { %v299_v48 = vmax.f32 %v294_v47, 0.0 }
  0xc6   : > { %345 = vmatmul.f32.gmra.mxu3 %v299_v48 }
 0x135   : > { %v337_v50 = vpop.f32.mrf.mxu1 }
 0x136   : > { %v338_v51 = vadd.f32 %v545_v49, %v337_v50 }
 0x138   : > { %349 = vst [vmem:[%s235_s7] sm:$0xff] %v338_v51 }
 0x13d   : > { %v340_v52 = vpop.f32.mrf.mxu1 }
 0x13e   : > { %v341_v53 = vadd.f32 %v545_v49, %v340_v52 }
 0x140   : > { %350 = vst [vmem:[%s235_s7 + $0x8] sm:$0xff] %v341_v53 }
 0x141   : > { %v343_v54 = vpop.f32.mrf.mxu3 }
 0x142   : > { %v344_v55 = vadd.f32 %v545_v49, %v343_v54 }
 0x144   : > { %351 = vst [vmem:[%s235_s7 + $0x10] sm:$0xff] %v344_v55 }
 0x149   : > { %v346_v56 = vpop.f32.mrf.mxu3 }
 0x14a   : > { %v347_v57 = vadd.f32 %v545_v49, %v346_v56 }
 0x14c   : > { %352 = vst [vmem:[%s235_s7 + $0x18] sm:$0xff] %v347_v57 }
 0x14d   : > { %603 = shalt.err (!%p600_p8)
}
 0x14e   : > { %s647_s25 = smov 128   ;;  %s648_s6 = smov 8  }
 0x14f   : > { %494 = dma.vmem_to_hbm [thread:$0]  (%p717_p5), %s367_s13, 512, %s369_s14, %s354_s15, %s647_s25, %s647_s25, %s648_s6  }
 0x150 PF: > { %p506_p9 = scmp.ge.s32.totalorder %s642_s21, 2  ;;  %s383_s7 = sand.u32 1, %s630_s18  }
 0x151   : > { %s384_s8 = scalar_lea.sflag [#allocation4], %s383_s7 }
 0x152   : > { %p501_p10 = pnand %p506_p9, %p721_p6 }
 0x154   : > { %p502_p11 = pneg %p501_p10 }
 0x156   : > { %625 = dma.done.wait (%p502_p11), %s384_s8, 512  }
 0x157   : > { %627 = vsyncadd (%p502_p11), %s384_s8, 4294966784  ;;  %p16_p12 = scmp.ge.s32.totalorder %s704_s24, 4   ;;  %s835_s18 = smov %s634_s19 }
 0x158   : > { %s836_s19 = smov %s638_s20  ;;  %s837_s20 = smov %s715_s27 }
 0x159   : > { %s838_s21 = smov %s704_s24  ;;  %18 = sbr.rel (!%p16_p12) target bundleno = 4 (0x4), region = 80 }
 0x15e   :  { %390 = vsyncpa [#allocation3], 1 }
 0x15f   :  { %392 = vsyncpa [#allocation3 + $0x1], 1 }
 0x160   :  { %393 = vsyncpa [#allocation4], 1 }
 0x161   :  { %395 = vsyncpa [#allocation4 + $0x1], 1 }

</bundles_post_ra>
